<compile_context>
chip_gen: v6e
topology: v6e:2x2x1
jax: 0.10.0
libtpu: 0.0.40
codegen_flags: <defaults>
</compile_context>

<pallas_src>
import jax
import jax.numpy as jnp
from jax.experimental import pallas as pl
from jax.experimental.pallas import tpu as pltpu


def _round_up(v: int, m: int) -> int:
    return ((v + m - 1) // m) * m


# ---------------------------------------------------------------------------
# Fused recurrent kernel: TB timesteps per grid step.
#   xproj = x_chunk @ Wx_aug                (bias + output-lane mask folded in)
#   for k in [0, TB):                       (unrolled serial recurrence)
#       pre   = h @ Wh + xproj[k*Bp : (k+1)*Bp]
#       h     = tanh(pre[:, :HP])
#       out_k = log_softmax(pre[:, HP:])
# Hidden state persists across grid steps in the resident hfin_ref output.
# ---------------------------------------------------------------------------
def _make_chunk_kernel(tb: int, bp: int, hp: int, t_real: int, guard_tail: bool):
    def chunk_kernel(h0_ref, x_ref, wxa_ref, wh_ref, out_ref, hfin_ref,
                     xproj_scr):
        g = pl.program_id(0)

        @pl.when(g == 0)
        def _init():
            hfin_ref[...] = h0_ref[...]

        # One MXU matmul projects the whole chunk; bias (and the -1e30 mask for
        # padded output lanes) rides along in Wx_aug's last row (ones column).
        xproj_scr[...] = jnp.dot(
            x_ref[...], wxa_ref[...], preferred_element_type=jnp.float32)

        wh = wh_ref[...]                      # resident weights, hoisted load

        def body(k, h_prev):
            row = pl.multiple_of(k * bp, 8)
            pre = (
                jnp.dot(h_prev, wh, preferred_element_type=jnp.float32)
                + xproj_scr[pl.ds(row, bp), :]
            )                                                  # (Bp, HP+OP)

            h_new = jnp.tanh(pre[:, :hp])

            # log_softmax over the lane axis.  Padded output lanes hold exactly
            # -1e30 (zero weights + folded bias), so exp() kills them; no iota,
            # no compare/select in the serial loop.
            logits = pre[:, hp:]
            m = jnp.max(logits, axis=1, keepdims=True)
            shifted = logits - m
            denom = jnp.sum(jnp.exp(shifted), axis=1, keepdims=True)
            out_ref[pl.ds(row, bp), :] = shifted - jnp.log(denom)

            if guard_tail:
                # Padded tail timesteps (beyond T) must not advance the state.
                return jnp.where(g * tb + k < t_real, h_new, h_prev)
            return h_new

        hfin_ref[...] = jax.lax.fori_loop(
            0, tb, body, hfin_ref[...], unroll=True)

    return chunk_kernel


# ---------------------------------------------------------------------------
# Wrappers
# ---------------------------------------------------------------------------
@jax.jit
def vanilla_rnn_forward_seq(x_seq, h0, w_hidden, b_hidden, w_output, b_output):
    """Run the VanillaRNN cell over a sequence.

    x_seq: (T, B, I), h0: (B, H).
    PyTorch weight layout: w_hidden (H, I+H), b_hidden (H,),
                           w_output (O, I+H), b_output (O,).
    Returns (outputs (T, B, O) log-probs, final hidden (B, H)).
    """
    T, B, I = x_seq.shape
    H = h0.shape[1]
    O = w_output.shape[0]

    Bp = _round_up(max(B, 8), 8)        # sublane-aligned batch
    HP = _round_up(H, 128)              # lane-aligned hidden
    OP = _round_up(O, 128)              # lane-aligned output
    F = HP + OP
    f32 = jnp.float32

    TB = min(T, 32)                     # timesteps per grid step
    n_chunks = pl.cdiv(T, TB)
    Tp = n_chunks * TB                  # time padded to a whole number of chunks

    # ---- fused / padded parameters (wrapper glue, fused under jit) ----------
    # Wx_aug: (I+1, F); rows 0..I-1 = input part of [W_hid | W_out]^T, last row
    # = fused bias with -1e30 in padded output lanes (softmax mask for free).
    wxa = jnp.zeros((I + 1, F), f32)
    wxa = wxa.at[:I, :H].set(w_hidden[:, :I].T.astype(f32))
    wxa = wxa.at[:I, HP:HP + O].set(w_output[:, :I].T.astype(f32))
    wxa = wxa.at[I, :H].set(b_hidden.astype(f32))
    wxa = wxa.at[I, HP:HP + O].set(b_output.astype(f32))
    if O < OP:
        wxa = wxa.at[I, HP + O:].set(jnp.float32(-1e30))

    # Wh_fused: (HP, F) = hidden part of [W_hid | W_out]^T, zero-padded.
    wh = jnp.zeros((HP, F), f32)
    wh = wh.at[:H, :H].set(w_hidden[:, I:].T.astype(f32))
    wh = wh.at[:H, HP:HP + O].set(w_output[:, I:].T.astype(f32))

    # Padded inputs with an appended ones-column (carries the bias).
    x_pad = jnp.zeros((Tp, Bp, I), f32).at[:T, :B, :].set(x_seq.astype(f32))
    ones = jnp.ones((Tp, Bp, 1), f32)
    x_aug = jnp.concatenate([x_pad, ones], axis=-1).reshape(Tp * Bp, I + 1)

    h0p = jnp.zeros((Bp, HP), f32).at[:B, :H].set(h0.astype(f32))

    kernel = _make_chunk_kernel(TB, Bp, HP, T, guard_tail=(Tp != T))

    out_flat, h_fin = pl.pallas_call(
        kernel,
        grid=(n_chunks,),
        in_specs=[
            pl.BlockSpec((Bp, HP), lambda g: (0, 0)),          # h0 (resident)
            pl.BlockSpec((TB * Bp, I + 1), lambda g: (g, 0)),  # x chunk (streamed)
            pl.BlockSpec((I + 1, F), lambda g: (0, 0)),        # Wx_aug (resident)
            pl.BlockSpec((HP, F), lambda g: (0, 0)),           # Wh (resident)
        ],
        out_specs=[
            pl.BlockSpec((TB * Bp, OP), lambda g: (g, 0)),     # log-probs chunk
            pl.BlockSpec((Bp, HP), lambda g: (0, 0)),          # final hidden
        ],
        out_shape=[
            jax.ShapeDtypeStruct((Tp * Bp, OP), f32),
            jax.ShapeDtypeStruct((Bp, HP), f32),
        ],
        scratch_shapes=[pltpu.VMEM((TB * Bp, F), f32)],        # per-chunk xproj
        compiler_params=pltpu.CompilerParams(
            dimension_semantics=("arbitrary",)),
    )(h0p, x_aug, wxa, wh)

    out = out_flat.reshape(Tp, Bp, OP)[:T, :B, :O]
    h_new = h_fin[:B, :H]
    return out, h_new


def vanilla_rnn_forward(x, h, w_hidden, b_hidden, w_output, b_output):
    """Exact VanillaRNN.forward: x (B, I), h (B, H) -> (output (B, O), hidden (B, H))."""
    out_seq, h_new = vanilla_rnn_forward_seq(
        x[None], h, w_hidden, b_hidden, w_output, b_output)
    return out_seq[0], h_new


# ---------------------------------------------------------------------------
# Pure-JAX reference mirroring the PyTorch module.
# ---------------------------------------------------------------------------
def _ref_step(x, h, w_hidden, b_hidden, w_output, b_output):
    concat = jnp.concatenate([x, h], axis=1)
    h_new = jnp.tanh(concat @ w_hidden.T + b_hidden)
    out = jax.nn.log_softmax(concat @ w_output.T + b_output, axis=1)
    return out, h_new


if __name__ == "__main__":
    batch, input_size, hidden_size, output_size, seq_len = 2, 16, 32, 10, 8

    key = jax.random.PRNGKey(0)
    kx, kh, k1, k2, k3, k4 = jax.random.split(key, 6)

    x_seq = jax.random.normal(kx, (seq_len, batch, input_size), dtype=jnp.float32)
    h0 = jax.random.normal(kh, (batch, hidden_size), dtype=jnp.float32)

    fan_in = input_size + hidden_size
    bound = 1.0 / (fan_in ** 0.5)
    w_hidden = jax.random.uniform(k1, (hidden_size, fan_in),
                                  minval=-bound, maxval=bound, dtype=jnp.float32)
    b_hidden = jax.random.uniform(k2, (hidden_size,),
                                  minval=-bound, maxval=bound, dtype=jnp.float32)
    w_output = jax.random.uniform(k3, (output_size, fan_in),
                                  minval=-bound, maxval=bound, dtype=jnp.float32)
    b_output = jax.random.uniform(k4, (output_size,),
                                  minval=-bound, maxval=bound, dtype=jnp.float32)

    # ---- single-step call: exact module forward semantics -------------------
    out1, h1 = vanilla_rnn_forward(x_seq[0], h0, w_hidden, b_hidden,
                                   w_output, b_output)
    jax.block_until_ready((out1, h1))
    out1_ref, h1_ref = _ref_step(x_seq[0], h0, w_hidden, b_hidden,
                                 w_output, b_output)
    assert jnp.allclose(out1, out1_ref, atol=1e-4, rtol=1e-4), "step output mismatch"
    assert jnp.allclose(h1, h1_ref, atol=1e-4, rtol=1e-4), "step hidden mismatch"

    # ---- fused sequence call (single chunk, T=8) -----------------------------
    out_seq, h_fin = vanilla_rnn_forward_seq(x_seq, h0, w_hidden, b_hidden,
                                             w_output, b_output)
    jax.block_until_ready((out_seq, h_fin))

    h_r = h0
    for t in range(seq_len):
        o_r, h_r = _ref_step(x_seq[t], h_r, w_hidden, b_hidden,
                             w_output, b_output)
        assert jnp.allclose(out_seq[t], o_r, atol=1e-4, rtol=1e-4), \
            f"seq output mismatch at t={t}"
    assert jnp.allclose(h_fin, h_r, atol=1e-4, rtol=1e-4), "final hidden mismatch"

    # ---- longer sequence: exercises multi-chunk grid + padded-tail guard -----
    seq_len2 = 40                              # 2 chunks of 32, 24-step tail pad
    x_seq2 = jax.random.normal(jax.random.PRNGKey(1),
                               (seq_len2, batch, input_size), dtype=jnp.float32)
    out_seq2, h_fin2 = vanilla_rnn_forward_seq(x_seq2, h0, w_hidden, b_hidden,
                                               w_output, b_output)
    jax.block_until_ready((out_seq2, h_fin2))
    h_r = h0
    for t in range(seq_len2):
        o_r, h_r = _ref_step(x_seq2[t], h_r, w_hidden, b_hidden,
                             w_output, b_output)
        assert jnp.allclose(out_seq2[t], o_r, atol=1e-3, rtol=1e-3), \
            f"long-seq output mismatch at t={t}"
    assert jnp.allclose(h_fin2, h_r, atol=1e-3, rtol=1e-3), "long-seq hidden mismatch"

    print("KERNEL_OK")
</pallas_src>

<mosaic_0001>
module attributes {stable_mosaic.version = 11 : i64} {
  func.func @chunk_kernel(%arg0: i32, %arg1: memref<8x128xf32, #tpu.memory_space<vmem>>, %arg2: memref<8x17xf32, #tpu.memory_space<vmem>>, %arg3: memref<17x256xf32, #tpu.memory_space<vmem>>, %arg4: memref<128x256xf32, #tpu.memory_space<vmem>>, %arg5: memref<8x128xf32, #tpu.memory_space<vmem>>, %arg6: memref<8x128xf32, #tpu.memory_space<vmem>>, %arg7: memref<8x256xf32, #tpu.memory_space<vmem>>) attributes {dimension_semantics = [#tpu.dimension_semantics<arbitrary>], iteration_bounds = array<i64: 1>, scalar_prefetch = 0 : i64, scratch_operands = 1 : i64, tpu.core_type = #tpu.core_type<tc>, window_params = [{pipeline_mode = #tpu.pipeline_mode<synchronous>, transform_indices = @transform_0, window_bounds = array<i64: 8, 128>}, {transform_indices = @transform_1, window_bounds = array<i64: 8, 17>}, {pipeline_mode = #tpu.pipeline_mode<synchronous>, transform_indices = @transform_2, window_bounds = array<i64: 17, 256>}, {pipeline_mode = #tpu.pipeline_mode<synchronous>, transform_indices = @transform_3, window_bounds = array<i64: 128, 256>}, {transform_indices = @transform_4, window_bounds = array<i64: 8, 128>}, {pipeline_mode = #tpu.pipeline_mode<synchronous>, transform_indices = @transform_5, window_bounds = array<i64: 8, 128>}]} {
    %c0_i32 = arith.constant 0 : i32
    %0 = arith.cmpi eq, %arg0, %c0_i32 : i32
    %1 = arith.extui %0 : i1 to i32
    %c0_i32_0 = arith.constant 0 : i32
    %2 = arith.cmpi ne, %1, %c0_i32_0 : i32
    scf.if %2 {
      %c0_18 = arith.constant 0 : index
      %c0_19 = arith.constant 0 : index
      %31 = vector.load %arg1[%c0_18, %c0_19] : memref<8x128xf32, #tpu.memory_space<vmem>>, vector<8x128xf32>
      %c0_20 = arith.constant 0 : index
      %c0_21 = arith.constant 0 : index
      %32 = vector.load %arg6[%c0_20, %c0_21] : memref<8x128xf32, #tpu.memory_space<vmem>>, vector<8x128xf32>
      tpu.vector_store %arg6[%c0_20, %c0_21], %31 {strides = array<i32>} : memref<8x128xf32, #tpu.memory_space<vmem>>, vector<8x128xf32>,
    } else {
    }
    %c0 = arith.constant 0 : index
    %c0_1 = arith.constant 0 : index
    %3 = vector.load %arg2[%c0, %c0_1] : memref<8x17xf32, #tpu.memory_space<vmem>>, vector<8x17xf32>
    %c0_2 = arith.constant 0 : index
    %c0_3 = arith.constant 0 : index
    %4 = vector.load %arg3[%c0_2, %c0_3] : memref<17x256xf32, #tpu.memory_space<vmem>>, vector<17x256xf32>
    %cst = arith.constant dense<0.000000e+00> : vector<8x256xf32>
    %5 = tpu.matmul %3, %4, %cst {dimension_numbers = #tpu.dot_dimension_numbers<[1], [0], [0], [1], [0, 0, 1, 1], [], []>} : vector<8x17xf32>, vector<17x256xf32>, vector<8x256xf32> -> vector<8x256xf32>
    %c0_4 = arith.constant 0 : index
    %c0_5 = arith.constant 0 : index
    %6 = vector.load %arg7[%c0_4, %c0_5] : memref<8x256xf32, #tpu.memory_space<vmem>>, vector<8x256xf32>
    tpu.vector_store %arg7[%c0_4, %c0_5], %5 {strides = array<i32>} : memref<8x256xf32, #tpu.memory_space<vmem>>, vector<8x256xf32>,
    %c0_6 = arith.constant 0 : index
    %c0_7 = arith.constant 0 : index
    %7 = vector.load %arg4[%c0_6, %c0_7] : memref<128x256xf32, #tpu.memory_space<vmem>>, vector<128x256xf32>
    %c0_8 = arith.constant 0 : index
    %c0_9 = arith.constant 0 : index
    %8 = vector.load %arg6[%c0_8, %c0_9] : memref<8x128xf32, #tpu.memory_space<vmem>>, vector<8x128xf32>
    %c0_i32_10 = arith.constant 0 : i32
    %c8_i32 = arith.constant 8 : i32
    %9 = arith.muli %c0_i32_10, %c8_i32 : i32
    %10 = tpu.assume_multiple %9, 8 : i32
    %cst_11 = arith.constant dense<0.000000e+00> : vector<8x256xf32>
    %11 = tpu.matmul %8, %7, %cst_11 {dimension_numbers = #tpu.dot_dimension_numbers<[1], [0], [0], [1], [0, 0, 1, 1], [], []>} : vector<8x128xf32>, vector<128x256xf32>, vector<8x256xf32> -> vector<8x256xf32>
    %12 = arith.index_cast %10 : i32 to index
    %c0_12 = arith.constant 0 : index
    %13 = vector.load %arg7[%12, %c0_12] : memref<8x256xf32, #tpu.memory_space<vmem>>, vector<8x256xf32>
    %14 = arith.addf %11, %13 : vector<8x256xf32>
    %15 = vector.extract_strided_slice %14 {offsets = [0, 0], sizes = [8, 128], strides = [1, 1]} : vector<8x256xf32> to vector<8x128xf32>
    %16 = math.tanh %15 : vector<8x128xf32>
    %17 = vector.extract_strided_slice %14 {offsets = [0, 128], sizes = [8, 128], strides = [1, 1]} : vector<8x256xf32> to vector<8x128xf32>
    %cst_13 = arith.constant dense<0xFF800000> : vector<8xf32>
    %18 = vector.multi_reduction <maximumf>, %17, %cst_13 [1] : vector<8x128xf32> to vector<8xf32>
    %19 = vector.shape_cast %18 : vector<8xf32> to vector<8x1xf32>
    %20 = vector.broadcast %19 : vector<8x1xf32> to vector<8x128xf32>
    %21 = arith.subf %17, %20 : vector<8x128xf32>
    %22 = math.exp %21 : vector<8x128xf32>
    %cst_14 = arith.constant dense<0.000000e+00> : vector<8xf32>
    %23 = vector.multi_reduction <add>, %22, %cst_14 [1] : vector<8x128xf32> to vector<8xf32>
    %24 = vector.shape_cast %23 : vector<8xf32> to vector<8x1xf32>
    %25 = math.log %24 : vector<8x1xf32>
    %26 = vector.broadcast %25 : vector<8x1xf32> to vector<8x128xf32>
    %27 = arith.subf %21, %26 : vector<8x128xf32>
    %28 = arith.index_cast %10 : i32 to index
    %c0_15 = arith.constant 0 : index
    %29 = vector.load %arg5[%28, %c0_15] : memref<8x128xf32, #tpu.memory_space<vmem>>, vector<8x128xf32>
    tpu.vector_store %arg5[%28, %c0_15], %27 {strides = array<i32>} : memref<8x128xf32, #tpu.memory_space<vmem>>, vector<8x128xf32>,
    %c1_i32 = arith.constant 1 : i32
    %c0_16 = arith.constant 0 : index
    %c0_17 = arith.constant 0 : index
    %30 = vector.load %arg6[%c0_16, %c0_17] : memref<8x128xf32, #tpu.memory_space<vmem>>, vector<8x128xf32>
    tpu.vector_store %arg6[%c0_16, %c0_17], %16 {strides = array<i32>} : memref<8x128xf32, #tpu.memory_space<vmem>>, vector<8x128xf32>,
    return
  }
  func.func @transform_0(%arg0: i32) -> (i32, i32) {
    %c0_i32 = arith.constant 0 : i32
    %c0_i32_0 = arith.constant 0 : i32
    %c0_i32_1 = arith.constant 0 : i32
    return %c0_i32, %c0_i32_0 : i32, i32
  }
  func.func @transform_1(%arg0: i32) -> (i32, i32) {
    %c0_i32 = arith.constant 0 : i32
    %c0_i32_0 = arith.constant 0 : i32
    return %arg0, %c0_i32 : i32, i32
  }
  func.func @transform_2(%arg0: i32) -> (i32, i32) {
    %c0_i32 = arith.constant 0 : i32
    %c0_i32_0 = arith.constant 0 : i32
    %c0_i32_1 = arith.constant 0 : i32
    return %c0_i32, %c0_i32_0 : i32, i32
  }
  func.func @transform_3(%arg0: i32) -> (i32, i32) {
    %c0_i32 = arith.constant 0 : i32
    %c0_i32_0 = arith.constant 0 : i32
    %c0_i32_1 = arith.constant 0 : i32
    return %c0_i32, %c0_i32_0 : i32, i32
  }
  func.func @transform_4(%arg0: i32) -> (i32, i32) {
    %c0_i32 = arith.constant 0 : i32
    %c0_i32_0 = arith.constant 0 : i32
    return %arg0, %c0_i32 : i32, i32
  }
  func.func @transform_5(%arg0: i32) -> (i32, i32) {
    %c0_i32 = arith.constant 0 : i32
    %c0_i32_0 = arith.constant 0 : i32
    %c0_i32_1 = arith.constant 0 : i32
    return %c0_i32, %c0_i32_0 : i32, i32
  }
}

</mosaic_0001>

<bundles_post_ra>
// kernel: vanilla_rnn_forward_seq.1
= control target key start
LH: loop header
LB: loop body
LE: loop exit
PB: predicated region body
PF: predicated region fallthrough
CT: control target
= control target key end

     0   :  { %v256_v3 = vmov 0.0   ;;  %vm36_vm0 = vcmask 1040384   ;;  %vm32_vm1 = vcmask 138240   ;;  %s413_s3 = inlined_call_operand.vmem [shape: f32[128,256], index: 3, kind: input, shape index: {}]   ;;  %s414_s2 = inlined_call_operand.vmem [shape: f32[17,256], index: 2, kind: input, shape index: {}]   ;;  %s415_s1 = inlined_call_operand.vmem [shape: f32[8,17], index: 1, kind: input, shape index: {}]   ;;  %s416_s0 = inlined_call_operand.vmem [shape: f32[8,128], index: 0, kind: input, shape index: {}]   ;;  %s417_s5 = inlined_call_operand.vmem [shape: f32[8,128], index: 5, kind: output, shape index: {1}]   ;;  %s418_s4 = inlined_call_operand.vmem [shape: f32[8,128], index: 4, kind: output, shape index: {0}]  }
   0x1   :  { %v147_v0 = vld [vmem:[%s413_s3 + $0xf8] sm:$0xff]  ;;  %v146_v1 = vld [vmem:[%s413_s3 + $0xf0] sm:$0xff]  ;;  %v145_v2 = vld [vmem:[%s413_s3 + $0xe8] sm:$0xff]  ;;  %107 = vmatprep.mubr.f32.mxu0 %v256_v3  ;;  %218 = vmatprep.mubr.f32.mxu1 %v256_v3 }
   0x2   :  { %154 = vmatprep.subr.mxu1 %v147_v0  ;;  %v144_v4 = vld [vmem:[%s413_s3 + $0xe0] sm:$0xff]  ;;  %v143_v5 = vld [vmem:[%s413_s3 + $0xd8] sm:$0xff]  ;;  %v142_v6 = vld [vmem:[%s413_s3 + $0xd0] sm:$0xff] }
   0x3   :  { %155 = vmatpush1.msra.mxu1 %v146_v1  ;;  %v141_v7 = vld [vmem:[%s413_s3 + $0xc8] sm:$0xff]  ;;  %v140_v8 = vld [vmem:[%s413_s3 + $0xc0] sm:$0xff]  ;;  %v139_v9 = vld [vmem:[%s413_s3 + $0xb8] sm:$0xff] }
   0x4   :  { %156 = vmatprep.subr.mxu1 %v145_v2  ;;  %v138_v10 = vld [vmem:[%s413_s3 + $0xb0] sm:$0xff]  ;;  %v137_v11 = vld [vmem:[%s413_s3 + $0xa8] sm:$0xff]  ;;  %v30_v13 = vld [vmem:[%s414_s2 + $0x20] sm:$0x1] }
   0x5   :  { %157 = vmatpush1.msra.mxu1 %v144_v4  ;;  %v31_v12 = vld [vmem:[%s414_s2 + $0x28] sm:$0x1]  ;;  %v136_v14 = vld [vmem:[%s413_s3 + $0xa0] sm:$0xff]  ;;  %v29_v15 = vld [vmem:[%s414_s2 + $0x18] sm:$0xff] }
   0x6   :  { %158 = vmatprep.subr.mxu1 %v143_v5  ;;  %246 = vmatprep.subr.msk.mxu0 %vm36_vm0, %v31_v12  ;;  %v135_v16 = vld [vmem:[%s413_s3 + $0x98] sm:$0xff]  ;;  %v28_v17 = vld [vmem:[%s414_s2 + $0x10] sm:$0xff]  ;;  %v27_v18 = vld [vmem:[%s414_s2 + $0x8] sm:$0xff] }
   0x7   :  { %159 = vmatpush1.msra.mxu1 %v142_v6  ;;  %247 = vmatpush1.msk.msra.mxu0 %vm36_vm0, %v30_v13  ;;  %v134_v19 = vld [vmem:[%s413_s3 + $0x90] sm:$0xff]  ;;  %v26_v20 = vld [vmem:[%s414_s2] sm:$0xff]  ;;  %v133_v21 = vld [vmem:[%s413_s3 + $0x88] sm:$0xff] }
   0x8   :  { %160 = vmatprep.subr.mxu1 %v141_v7  ;;  %71 = vmatprep.subr.mxu0 %v29_v15  ;;  %v25_v22 = vld [vmem:[%s415_s1] sm:$0xff]  ;;  %v131_v24 = vld [vmem:[%s413_s3 + $0x78] sm:$0xff]  ;;  %v130_v25 = vld [vmem:[%s413_s3 + $0x70] sm:$0xff] }
   0x9   :  { %161 = vmatpush1.msra.mxu1 %v140_v8  ;;  %72 = vmatpush1.msra.mxu0 %v28_v17  ;;  %v132_v23 = vld [vmem:[%s413_s3 + $0x80] sm:$0xff]  ;;  %v129_v26 = vld [vmem:[%s413_s3 + $0x68] sm:$0xff]  ;;  %v127_v28 = vld [vmem:[%s413_s3 + $0x58] sm:$0xff] }
   0xa   :  { %162 = vmatprep.subr.mxu1 %v139_v9  ;;  %73 = vmatprep.subr.mxu0 %v27_v18  ;;  %v128_v27 = vld [vmem:[%s413_s3 + $0x60] sm:$0xff]  ;;  %v126_v29 = vld [vmem:[%s413_s3 + $0x50] sm:$0xff]  ;;  %v125_v30 = vld [vmem:[%s413_s3 + $0x48] sm:$0xff] }
   0xb   :  { %163 = vmatpush1.msra.mxu1 %v138_v10  ;;  %74 = vmatpush1.msra.mxu0 %v26_v20  ;;  %v124_v31 = vld [vmem:[%s413_s3 + $0x40] sm:$0xff]  ;;  %v123_v32 = vld [vmem:[%s413_s3 + $0x38] sm:$0xff]  ;;  %v122_v33 = vld [vmem:[%s413_s3 + $0x30] sm:$0xff] }
   0xc   :  { %164 = vmatprep.subr.mxu1 %v137_v11  ;;  %248 = vmatmul.mubr.msk.f32.vlgmr.msra.gmra.mxu0 %vm32_vm1, %v25_v22  ;;  %v121_v34 = vld [vmem:[%s413_s3 + $0x28] sm:$0xff]  ;;  %v120_v35 = vld [vmem:[%s413_s3 + $0x20] sm:$0xff]  ;;  %v119_v36 = vld [vmem:[%s413_s3 + $0x18] sm:$0xff] }
   0xd   :  { %165 = vmatpush1.msra.mxu1 %v136_v14  ;;  %v118_v37 = vld [vmem:[%s413_s3 + $0x10] sm:$0xff]  ;;  %v117_v38 = vld [vmem:[%s413_s3 + $0x8] sm:$0xff]  ;;  %v116_v39 = vld [vmem:[%s413_s3] sm:$0xff] }
   0xe   :  { %166 = vmatprep.subr.mxu1 %v135_v16  ;;  %v23_v40 = vld [vmem:[%s416_s0] sm:$0xff] }
   0xf   :  { %167 = vmatpush1.msra.mxu1 %v134_v19 }
  0x10   :  { %168 = vmatprep.subr.mxu1 %v133_v21 }
  0x11   :  { %169 = vmatpush1.msra.mxu1 %v132_v23 }
  0x12   :  { %170 = vmatprep.subr.mxu1 %v131_v24 }
  0x13   :  { %171 = vmatpush1.msra.mxu1 %v130_v25 }
  0x14   :  { %172 = vmatprep.subr.mxu1 %v129_v26 }
  0x15   :  { %173 = vmatpush1.msra.mxu1 %v128_v27 }
  0x16   :  { %174 = vmatprep.subr.mxu1 %v127_v28 }
  0x17   :  { %175 = vmatpush1.msra.mxu1 %v126_v29 }
  0x18   :  { %176 = vmatprep.subr.mxu1 %v125_v30 }
  0x19   :  { %177 = vmatpush1.msra.mxu1 %v124_v31 }
  0x1a   :  { %178 = vmatprep.subr.mxu1 %v123_v32 }
  0x1b   :  { %179 = vmatpush1.msra.mxu1 %v122_v33 }
  0x1c   :  { %180 = vmatprep.subr.mxu1 %v121_v34 }
  0x1d   :  { %181 = vmatpush1.msra.mxu1 %v120_v35 }
  0x1e   :  { %182 = vmatprep.subr.mxu1 %v119_v36 }
  0x1f   :  { %183 = vmatpush1.msra.mxu1 %v118_v37 }
  0x20   :  { %184 = vmatprep.subr.mxu1 %v117_v38 }
  0x21   :  { %185 = vmatpush1.msra.mxu1 %v116_v39 }
  0x22   :  { %219 = vmatmul.mubr.f32.vlgmr.msra.gmra.mxu1 %v23_v40 }
  0xcc   :  { %v109_v41 = vpop.f32.mrf.mxu0 }
  0xce   :  { %v111_v44 = vpop.f32.mrf.mxu0 }
  0xe2   :  { %v220_v42 = vpop.f32.mrf.mxu1 }
  0xe3   :  { %v221_v43 = vadd.f32 %v220_v42, %v109_v41 }
  0xe4   :  { %v222_v45 = vpop.f32.mrf.mxu1 }
  0xe5   :  { %250 = vtanh.f32 %v221_v43  ;;  %v223_v46 = vadd.f32 %v222_v45, %v111_v44 }
  0xe7   :  { %226 = vmax.xlane.f32.xlu0 %v223_v46 }
  0xf2   :  { %v251_v47 = vpop.eup %250 }
  0xf3   :  { %237 = vst [vmem:[%s417_s5] sm:$0xff] %v251_v47 }
 0x170   :  { %v227_v48 = vpop.xlane.xlu0 %226 }
 0x171   :  { %v228_v49 = vsub.f32 %v223_v46, %v227_v48 }
 0x173   :  { %v229_v50 = vmul.f32 1.442695, %v228_v49 }
 0x175   :  { %252 = vpow2.f32 %v229_v50 }
 0x182   :  { %v253_v51 = vpop.eup %252 }
 0x183   :  { %231 = vadd.xlane.f32.xlu0 %v253_v51 }
 0x20c   :  { %v232_v52 = vpop.xlane.xlu0 %231 }
 0x20d   :  { %254 = vlog2.f32 %v232_v52 }
 0x21a   :  { %v255_v53 = vpop.eup %254 }
 0x21b   :  { %v234_v54 = vmul.f32 0.6931472, %v255_v53 }
 0x21d   :  { %v235_v55 = vsub.f32 %v228_v49, %v234_v54 }
 0x21f   :  { %236 = vst [vmem:[%s418_s4] sm:$0xff] %v235_v55 }

</bundles_post_ra>
